<compile_context>
chip_gen: v7x
topology: tpu7x:2x2x1
jax: 0.10.0
libtpu: 0.0.40
codegen_flags: <defaults>
</compile_context>

<pallas_src>
import jax
import jax.numpy as jnp
from jax.experimental import pallas as pl
from jax.experimental.pallas import tpu as pltpu


# ------------------------------ helpers -------------------------------------

def _cdiv(a, b):
    return -(-a // b)


def _round_up(x, m):
    return ((x + m - 1) // m) * m


# ------------------------------ kernel body ---------------------------------

def _fused_mlp_ln_kernel(num_linear, use_mask, eps=1e-5):
    """Transposed (lane-dense) fused MLP + LayerNorm.

    Refs:
      x_ref  : (d_in, T)        input columns = graph rows (nodes or edges)
      w_l    : (d_out_l, d_in_l) transposed weights (node/edge set picked by BlockSpec)
      b_l    : (d_out_l, 1)
      ln_ref : (3, d_out, 1)    rows = gamma, beta, mask/valid_count
      o_ref  : (d_out, T)
    """

    def kernel(*refs):
        x_ref = refs[0]
        wb = refs[1:1 + 2 * num_linear]          # (w0, b0, w1, b1, ...)
        ln_ref = refs[1 + 2 * num_linear]
        o_ref = refs[2 + 2 * num_linear]

        h = x_ref[...]                           # (d_in, T), f32

        for li in range(num_linear):
            w = wb[2 * li][...]                  # (d_out_l, d_in_l)
            b = wb[2 * li + 1][...]              # (d_out_l, 1) broadcasts over columns
            h = jnp.dot(w, h, preferred_element_type=jnp.float32) + b
            if li < num_linear - 1:
                h = jnp.maximum(h, 0.0)

        ln = ln_ref[...]                         # (3, d_out, 1)
        gamma, beta = ln[0], ln[1]

        # LayerNorm over the feature (sublane) axis, one normalization per column.
        if use_mask:
            # msc = mask / valid_count; zero on padded feature rows, sums to 1.
            msc = ln[2]
            mean = jnp.sum(h * msc, axis=0, keepdims=True)
            ctr = h - mean
            var = jnp.sum(ctr * ctr * msc, axis=0, keepdims=True)
        else:
            mean = jnp.mean(h, axis=0, keepdims=True)
            ctr = h - mean
            var = jnp.mean(ctr * ctr, axis=0, keepdims=True)
        y = ctr * jax.lax.rsqrt(var + eps)
        # gamma/beta are zero on padded feature rows -> padded output rows are 0.
        o_ref[...] = (y * gamma + beta).astype(o_ref.dtype)

    return kernel


# ------------------------------ host wrapper --------------------------------

def encoder_forward_pallas(x, e_features, fused, *, tile_cols=4096,
                           out_dtype=jnp.float32, eps=1e-5):
    """Fused node+edge MLP+LayerNorm in a single pallas_call (transposed layout).

    fused (see prepare_fused_params):
      'w' : list of [2, d_out_l, d_in_l] transposed, stacked (0=node, 1=edge), zero-padded
      'b' : list of [2, d_out_l, 1]
      'ln': [2, 3, d_out_pad, 1]  (gamma, beta, mask/count)
      'node_out', 'edge_out', 'use_mask'
    Returns (node_latents [N, node_out], edge_latents [E, edge_out]).
    """
    ws, bs, ln = fused["w"], fused["b"], fused["ln"]
    node_out, edge_out = fused["node_out"], fused["edge_out"]
    use_mask = fused["use_mask"]
    num_linear = len(ws)
    d_in = ws[0].shape[2]
    d_out = ws[-1].shape[1]

    N, node_in = x.shape
    E, edge_in = e_features.shape

    # Large lane tiles amortize the ~0.35us per-grid-step overhead; keep a multiple
    # of 128 lanes and clamp so tiny problems do not pay for excess padding.
    tile_cols = max(128, _round_up(min(tile_cols, max(N, E, 1)), 128))
    n_node_tiles = _cdiv(N, tile_cols)
    n_edge_tiles = _cdiv(E, tile_cols)
    n_tiles = n_node_tiles + n_edge_tiles            # >= 2 -> both v7x cores get work
    node_cols = n_node_tiles * tile_cols
    edge_cols = n_edge_tiles * tile_cols
    total_cols = node_cols + edge_cols

    # Pack both inputs into one lane-dense (features x rows) slab.  The transpose is
    # needed for the lane-dense layout anyway; pad + concat fuse into the same XLA
    # producer fusion (single HBM write).  Callers storing data in this layout can
    # feed the slab directly.
    xT = jnp.pad(x.astype(jnp.float32).T,
                 ((0, d_in - node_in), (0, node_cols - N)))
    eT = jnp.pad(e_features.astype(jnp.float32).T,
                 ((0, d_in - edge_in), (0, edge_cols - E)))
    xe = jnp.concatenate([xT, eT], axis=1)           # (d_in, total_cols)

    # Grid index -> which parameter set (0 = node, 1 = edge).
    def _sel(i):
        return (i >= n_node_tiles).astype(jnp.int32)

    def _param_spec(arr):
        # Whole parameter slab; leading (node/edge) axis squeezed away.
        return pl.BlockSpec((None,) + arr.shape[1:],
                            lambda i: (_sel(i),) + (0,) * (arr.ndim - 1))

    in_specs = [pl.BlockSpec((d_in, tile_cols), lambda i: (0, i))]
    operands = [xe]
    for w, b in zip(ws, bs):
        in_specs += [_param_spec(w), _param_spec(b)]
        operands += [w, b]
    in_specs.append(_param_spec(ln))
    operands.append(ln)

    out_spec = pl.BlockSpec((d_out, tile_cols), lambda i: (0, i))

    flops = 2 * total_cols * sum(int(w.shape[1]) * int(w.shape[2]) for w in ws)
    bytes_accessed = int(
        xe.size * 4
        + total_cols * d_out * jnp.dtype(out_dtype).itemsize
        + sum(int(w.size) + int(b.size) for w, b in zip(ws, bs)) * 4
        + int(ln.size) * 4)

    out_slab = pl.pallas_call(
        _fused_mlp_ln_kernel(num_linear, use_mask, eps),
        out_shape=jax.ShapeDtypeStruct((d_out, total_cols), out_dtype),
        grid_spec=pltpu.PrefetchScalarGridSpec(
            num_scalar_prefetch=0,
            grid=(n_tiles,),
            in_specs=in_specs,
            out_specs=out_spec,
        ),
        compiler_params=pltpu.CompilerParams(
            dimension_semantics=("parallel",),
            vmem_limit_bytes=32 * 1024 * 1024,
        ),
        cost_estimate=pl.CostEstimate(
            flops=flops,
            transcendentals=total_cols,              # one rsqrt per row/column
            bytes_accessed=bytes_accessed),
    )(*operands)

    # Slice + back-transpose to the module's (rows, features) convention; fused by
    # XLA into a single consumer per output.
    node_res = out_slab[:node_out, :N].T
    edge_res = out_slab[:edge_out, node_cols:node_cols + E].T
    return node_res, edge_res


# ----------------------------- parameter setup ------------------------------

def init_mlp_ln_params(key, in_dim, hidden_dim, out_dim, num_hidden_layers):
    """build_mlp(in, [hidden]*num_hidden_layers, out) + LayerNorm params.

    Weights returned as [d_in, d_out] (transposed vs torch.nn.Linear.weight)
    so that y = x @ W + b; biases/gamma/beta as [1, d_out].
    """
    sizes = [in_dim] + [hidden_dim] * num_hidden_layers + [out_dim]
    weights, biases = [], []
    for i in range(len(sizes) - 1):
        key, kw, kb = jax.random.split(key, 3)
        fan_in = sizes[i]
        scale = 1.0 / jnp.sqrt(jnp.float32(fan_in))
        w = jax.random.uniform(kw, (sizes[i], sizes[i + 1]),
                               minval=-scale, maxval=scale, dtype=jnp.float32)
        b = jax.random.uniform(kb, (1, sizes[i + 1]),
                               minval=-scale, maxval=scale, dtype=jnp.float32)
        weights.append(w)
        biases.append(b)
    gamma = jnp.ones((1, out_dim), dtype=jnp.float32)
    beta = jnp.zeros((1, out_dim), dtype=jnp.float32)
    return weights, biases, gamma, beta


def prepare_fused_params(node_params, edge_params):
    """Stack node/edge MLP params into transposed [2, ...] slabs, zero-padding mismatched dims."""
    nw, nb, ng, nbeta = node_params
    ew, eb, eg, ebeta = edge_params
    assert len(nw) == len(ew), "node/edge MLPs must have the same depth"
    num_linear = len(nw)

    ws, bs = [], []
    for li in range(num_linear):
        wat, wbt = nw[li].T, ew[li].T            # (d_out_l, d_in_l) transposed
        ba, bb = nb[li], eb[li]                  # (1, d_out_l)
        d_out_l = max(wat.shape[0], wbt.shape[0])
        d_in_l = max(wat.shape[1], wbt.shape[1])
        if li == 0:
            d_in_l = _round_up(d_in_l, 8)        # input-slab sublane alignment
        if li == num_linear - 1:
            d_out_l = _round_up(d_out_l, 8)      # output-slab sublane alignment
        padw = lambda w: jnp.pad(w, ((0, d_out_l - w.shape[0]), (0, d_in_l - w.shape[1])))
        padb = lambda b: jnp.pad(b.T, ((0, d_out_l - b.shape[1]), (0, 0)))
        ws.append(jnp.stack([padw(wat), padw(wbt)], axis=0))     # [2, d_out_l, d_in_l]
        bs.append(jnp.stack([padb(ba), padb(bb)], axis=0))       # [2, d_out_l, 1]

    node_out = nw[-1].shape[1]
    edge_out = ew[-1].shape[1]
    d_out_pad = _round_up(max(node_out, edge_out), 8)
    use_mask = (node_out != d_out_pad) or (edge_out != d_out_pad)

    def _ln_stack(gamma, beta, true_out):
        padv = lambda v: jnp.pad(v.T, ((0, d_out_pad - v.shape[1]), (0, 0)))  # (d_out_pad, 1)
        msc = jnp.concatenate(
            [jnp.full((true_out, 1), 1.0 / true_out, jnp.float32),
             jnp.zeros((d_out_pad - true_out, 1), jnp.float32)], axis=0)
        return jnp.stack([padv(gamma), padv(beta), msc], axis=0)             # (3, d_out_pad, 1)

    ln = jnp.stack([_ln_stack(ng, nbeta, node_out),
                    _ln_stack(eg, ebeta, edge_out)], axis=0)                  # (2, 3, d_out_pad, 1)

    return dict(w=ws, b=bs, ln=ln, node_out=node_out, edge_out=edge_out,
                use_mask=use_mask)


def mlp_layernorm_ref(x, weights, biases, gamma, beta, eps=1e-5):
    """Pure-JAX reference for correctness checking."""
    h = x
    for li, (w, b) in enumerate(zip(weights, biases)):
        h = h @ w + b
        if li < len(weights) - 1:
            h = jnp.maximum(h, 0.0)
    mean = jnp.mean(h, axis=-1, keepdims=True)
    var = jnp.mean((h - mean) ** 2, axis=-1, keepdims=True)
    h = (h - mean) * jax.lax.rsqrt(var + eps)
    return h * gamma + beta


# --------------------------------- Encoder ----------------------------------

class EncoderPallas:
    """JAX/Pallas equivalent of the PyTorch Encoder module."""

    def __init__(self, node_in, node_out, edge_in, edge_out,
                 mlp_num_layers, mlp_hidden_dim, key, tile_cols=4096,
                 out_dtype=jnp.float32):
        k_node, k_edge = jax.random.split(key)
        self.node_params = init_mlp_ln_params(
            k_node, node_in, mlp_hidden_dim, node_out, mlp_num_layers)
        self.edge_params = init_mlp_ln_params(
            k_edge, edge_in, mlp_hidden_dim, edge_out, mlp_num_layers)
        # Pre-stack/pad/transpose once; per-call host work is only the fused
        # transpose+pad+concat of the inputs.
        self.fused_params = prepare_fused_params(self.node_params, self.edge_params)
        self.tile_cols = tile_cols
        self.out_dtype = out_dtype

    def __call__(self, x, edge_index, e_features):
        # edge_index is unused in the forward pass (same as the PyTorch module).
        return encoder_forward_pallas(x, e_features, self.fused_params,
                                      tile_cols=self.tile_cols,
                                      out_dtype=self.out_dtype)


if __name__ == "__main__":
    key = jax.random.PRNGKey(0)

    # Small shapes consistent with the module.
    NODE_IN, NODE_OUT = 16, 32
    EDGE_IN, EDGE_OUT = 8, 32
    MLP_NUM_LAYERS, MLP_HIDDEN = 2, 32
    N_NODES, N_EDGES = 128, 256

    k_params, k_x, k_e, k_idx = jax.random.split(key, 4)

    enc = EncoderPallas(NODE_IN, NODE_OUT, EDGE_IN, EDGE_OUT,
                        MLP_NUM_LAYERS, MLP_HIDDEN, k_params)

    x = jax.random.normal(k_x, (N_NODES, NODE_IN), dtype=jnp.float32)
    e_features = jax.random.normal(k_e, (N_EDGES, EDGE_IN), dtype=jnp.float32)
    edge_index = jax.random.randint(k_idx, (2, N_EDGES), 0, N_NODES)  # unused

    node_out, edge_out = enc(x, edge_index, e_features)
    node_out = jax.block_until_ready(node_out)
    edge_out = jax.block_until_ready(edge_out)

    # Correctness check against pure-JAX reference.
    node_ref = mlp_layernorm_ref(x, *enc.node_params)
    edge_ref = mlp_layernorm_ref(e_features, *enc.edge_params)
    assert node_out.shape == (N_NODES, NODE_OUT)
    assert edge_out.shape == (N_EDGES, EDGE_OUT)
    assert jnp.allclose(node_out, node_ref, atol=1e-4, rtol=1e-4)
    assert jnp.allclose(edge_out, edge_ref, atol=1e-4, rtol=1e-4)

    print("KERNEL_OK")
</pallas_src>

<mosaic_0001>
module attributes {stable_mosaic.version = 11 : i64} {
  func.func @kernel(%arg0: i32, %arg1: memref<16x256xf32, #tpu.memory_space<vmem>>, %arg2: memref<1x32x16xf32, #tpu.memory_space<vmem>>, %arg3: memref<1x32x1xf32, #tpu.memory_space<vmem>>, %arg4: memref<1x32x32xf32, #tpu.memory_space<vmem>>, %arg5: memref<1x32x1xf32, #tpu.memory_space<vmem>>, %arg6: memref<1x32x32xf32, #tpu.memory_space<vmem>>, %arg7: memref<1x32x1xf32, #tpu.memory_space<vmem>>, %arg8: memref<1x3x32x1xf32, #tpu.memory_space<vmem>>, %arg9: memref<32x256xf32, #tpu.memory_space<vmem>>) attributes {dimension_semantics = [#tpu.dimension_semantics<parallel>], iteration_bounds = array<i64: 2>, scalar_prefetch = 0 : i64, scratch_operands = 0 : i64, tpu.core_type = #tpu.core_type<tc>, window_params = [{transform_indices = @transform_0, window_bounds = array<i64: 16, 256>}, {transform_indices = @transform_1, window_bounds = array<i64: 1, 32, 16>}, {transform_indices = @transform_2, window_bounds = array<i64: 1, 32, 1>}, {transform_indices = @transform_3, window_bounds = array<i64: 1, 32, 32>}, {transform_indices = @transform_4, window_bounds = array<i64: 1, 32, 1>}, {transform_indices = @transform_5, window_bounds = array<i64: 1, 32, 32>}, {transform_indices = @transform_6, window_bounds = array<i64: 1, 32, 1>}, {transform_indices = @transform_7, window_bounds = array<i64: 1, 3, 32, 1>}, {transform_indices = @transform_8, window_bounds = array<i64: 32, 256>}]} {
    %c0 = arith.constant 0 : index
    %c0_0 = arith.constant 0 : index
    %0 = vector.load %arg1[%c0, %c0_0] : memref<16x256xf32, #tpu.memory_space<vmem>>, vector<16x256xf32>
    %c0_1 = arith.constant 0 : index
    %c0_2 = arith.constant 0 : index
    %c0_3 = arith.constant 0 : index
    %1 = vector.load %arg2[%c0_1, %c0_2, %c0_3] : memref<1x32x16xf32, #tpu.memory_space<vmem>>, vector<1x32x16xf32>
    %2 = vector.shape_cast %1 : vector<1x32x16xf32> to vector<32x16xf32>
    %c0_4 = arith.constant 0 : index
    %c0_5 = arith.constant 0 : index
    %c0_6 = arith.constant 0 : index
    %3 = vector.load %arg3[%c0_4, %c0_5, %c0_6] : memref<1x32x1xf32, #tpu.memory_space<vmem>>, vector<1x32x1xf32>
    %4 = vector.shape_cast %3 : vector<1x32x1xf32> to vector<32x1xf32>
    %cst = arith.constant dense<0.000000e+00> : vector<32x256xf32>
    %5 = tpu.matmul %2, %0, %cst {dimension_numbers = #tpu.dot_dimension_numbers<[1], [0], [0], [1], [0, 0, 1, 1], [], []>} : vector<32x16xf32>, vector<16x256xf32>, vector<32x256xf32> -> vector<32x256xf32>
    %6 = vector.broadcast %4 : vector<32x1xf32> to vector<32x256xf32>
    %7 = arith.addf %5, %6 : vector<32x256xf32>
    %cst_7 = arith.constant 0.000000e+00 : f32
    %8 = vector.broadcast %cst_7 : f32 to vector<32x256xf32>
    %9 = arith.maximumf %7, %8 : vector<32x256xf32>
    %c0_8 = arith.constant 0 : index
    %c0_9 = arith.constant 0 : index
    %c0_10 = arith.constant 0 : index
    %10 = vector.load %arg4[%c0_8, %c0_9, %c0_10] : memref<1x32x32xf32, #tpu.memory_space<vmem>>, vector<1x32x32xf32>
    %11 = vector.shape_cast %10 : vector<1x32x32xf32> to vector<32x32xf32>
    %c0_11 = arith.constant 0 : index
    %c0_12 = arith.constant 0 : index
    %c0_13 = arith.constant 0 : index
    %12 = vector.load %arg5[%c0_11, %c0_12, %c0_13] : memref<1x32x1xf32, #tpu.memory_space<vmem>>, vector<1x32x1xf32>
    %13 = vector.shape_cast %12 : vector<1x32x1xf32> to vector<32x1xf32>
    %cst_14 = arith.constant dense<0.000000e+00> : vector<32x256xf32>
    %14 = tpu.matmul %11, %9, %cst_14 {dimension_numbers = #tpu.dot_dimension_numbers<[1], [0], [0], [1], [0, 0, 1, 1], [], []>} : vector<32x32xf32>, vector<32x256xf32>, vector<32x256xf32> -> vector<32x256xf32>
    %15 = vector.broadcast %13 : vector<32x1xf32> to vector<32x256xf32>
    %16 = arith.addf %14, %15 : vector<32x256xf32>
    %cst_15 = arith.constant 0.000000e+00 : f32
    %17 = vector.broadcast %cst_15 : f32 to vector<32x256xf32>
    %18 = arith.maximumf %16, %17 : vector<32x256xf32>
    %c0_16 = arith.constant 0 : index
    %c0_17 = arith.constant 0 : index
    %c0_18 = arith.constant 0 : index
    %19 = vector.load %arg6[%c0_16, %c0_17, %c0_18] : memref<1x32x32xf32, #tpu.memory_space<vmem>>, vector<1x32x32xf32>
    %20 = vector.shape_cast %19 : vector<1x32x32xf32> to vector<32x32xf32>
    %c0_19 = arith.constant 0 : index
    %c0_20 = arith.constant 0 : index
    %c0_21 = arith.constant 0 : index
    %21 = vector.load %arg7[%c0_19, %c0_20, %c0_21] : memref<1x32x1xf32, #tpu.memory_space<vmem>>, vector<1x32x1xf32>
    %22 = vector.shape_cast %21 : vector<1x32x1xf32> to vector<32x1xf32>
    %cst_22 = arith.constant dense<0.000000e+00> : vector<32x256xf32>
    %23 = tpu.matmul %20, %18, %cst_22 {dimension_numbers = #tpu.dot_dimension_numbers<[1], [0], [0], [1], [0, 0, 1, 1], [], []>} : vector<32x32xf32>, vector<32x256xf32>, vector<32x256xf32> -> vector<32x256xf32>
    %24 = vector.broadcast %22 : vector<32x1xf32> to vector<32x256xf32>
    %25 = arith.addf %23, %24 : vector<32x256xf32>
    %c0_23 = arith.constant 0 : index
    %c0_24 = arith.constant 0 : index
    %c0_25 = arith.constant 0 : index
    %c0_26 = arith.constant 0 : index
    %26 = vector.load %arg8[%c0_23, %c0_24, %c0_25, %c0_26] : memref<1x3x32x1xf32, #tpu.memory_space<vmem>>, vector<1x3x32x1xf32>
    %27 = vector.shape_cast %26 : vector<1x3x32x1xf32> to vector<3x32x1xf32>
    %28 = vector.extract_strided_slice %27 {offsets = [0, 0, 0], sizes = [1, 32, 1], strides = [1, 1, 1]} : vector<3x32x1xf32> to vector<1x32x1xf32>
    %29 = vector.shape_cast %28 : vector<1x32x1xf32> to vector<32x1xf32>
    %30 = vector.extract_strided_slice %27 {offsets = [1, 0, 0], sizes = [1, 32, 1], strides = [1, 1, 1]} : vector<3x32x1xf32> to vector<1x32x1xf32>
    %31 = vector.shape_cast %30 : vector<1x32x1xf32> to vector<32x1xf32>
    %cst_27 = arith.constant dense<0.000000e+00> : vector<256xf32>
    %32 = vector.multi_reduction <add>, %25, %cst_27 [0] : vector<32x256xf32> to vector<256xf32>
    %33 = vector.shape_cast %32 : vector<256xf32> to vector<1x256xf32>
    %cst_28 = arith.constant 3.200000e+01 : f32
    %34 = vector.broadcast %cst_28 : f32 to vector<1x256xf32>
    %35 = arith.divf %33, %34 : vector<1x256xf32>
    %36 = vector.broadcast %35 : vector<1x256xf32> to vector<32x256xf32>
    %37 = arith.subf %25, %36 : vector<32x256xf32>
    %38 = arith.mulf %37, %37 : vector<32x256xf32>
    %cst_29 = arith.constant dense<0.000000e+00> : vector<256xf32>
    %39 = vector.multi_reduction <add>, %38, %cst_29 [0] : vector<32x256xf32> to vector<256xf32>
    %40 = vector.shape_cast %39 : vector<256xf32> to vector<1x256xf32>
    %cst_30 = arith.constant 3.200000e+01 : f32
    %41 = vector.broadcast %cst_30 : f32 to vector<1x256xf32>
    %42 = arith.divf %40, %41 : vector<1x256xf32>
    %cst_31 = arith.constant 9.99999974E-6 : f32
    %43 = vector.broadcast %cst_31 : f32 to vector<1x256xf32>
    %44 = arith.addf %42, %43 : vector<1x256xf32>
    %45 = math.rsqrt %44 : vector<1x256xf32>
    %46 = vector.broadcast %45 : vector<1x256xf32> to vector<32x256xf32>
    %47 = arith.mulf %37, %46 : vector<32x256xf32>
    %48 = vector.broadcast %29 : vector<32x1xf32> to vector<32x256xf32>
    %49 = arith.mulf %47, %48 : vector<32x256xf32>
    %50 = vector.broadcast %31 : vector<32x1xf32> to vector<32x256xf32>
    %51 = arith.addf %49, %50 : vector<32x256xf32>
    %c0_32 = arith.constant 0 : index
    %c0_33 = arith.constant 0 : index
    %52 = vector.load %arg9[%c0_32, %c0_33] : memref<32x256xf32, #tpu.memory_space<vmem>>, vector<32x256xf32>
    tpu.vector_store %arg9[%c0_32, %c0_33], %51 {strides = array<i32>} : memref<32x256xf32, #tpu.memory_space<vmem>>, vector<32x256xf32>,
    return
  }
  func.func @transform_0(%arg0: i32) -> (i32, i32) {
    %c0_i32 = arith.constant 0 : i32
    %c0_i32_0 = arith.constant 0 : i32
    return %c0_i32, %arg0 : i32, i32
  }
  func.func @transform_1(%arg0: i32) -> (i32, i32, i32) {
    %c1_i32 = arith.constant 1 : i32
    %0 = arith.cmpi sge, %arg0, %c1_i32 : i32
    %1 = arith.extui %0 : i1 to i32
    %c0_i32 = arith.constant 0 : i32
    %c0_i32_0 = arith.constant 0 : i32
    %c0_i32_1 = arith.constant 0 : i32
    return %1, %c0_i32, %c0_i32_0 : i32, i32, i32
  }
  func.func @transform_2(%arg0: i32) -> (i32, i32, i32) {
    %c1_i32 = arith.constant 1 : i32
    %0 = arith.cmpi sge, %arg0, %c1_i32 : i32
    %1 = arith.extui %0 : i1 to i32
    %c0_i32 = arith.constant 0 : i32
    %c0_i32_0 = arith.constant 0 : i32
    %c0_i32_1 = arith.constant 0 : i32
    return %1, %c0_i32, %c0_i32_0 : i32, i32, i32
  }
  func.func @transform_3(%arg0: i32) -> (i32, i32, i32) {
    %c1_i32 = arith.constant 1 : i32
    %0 = arith.cmpi sge, %arg0, %c1_i32 : i32
    %1 = arith.extui %0 : i1 to i32
    %c0_i32 = arith.constant 0 : i32
    %c0_i32_0 = arith.constant 0 : i32
    %c0_i32_1 = arith.constant 0 : i32
    return %1, %c0_i32, %c0_i32_0 : i32, i32, i32
  }
  func.func @transform_4(%arg0: i32) -> (i32, i32, i32) {
    %c1_i32 = arith.constant 1 : i32
    %0 = arith.cmpi sge, %arg0, %c1_i32 : i32
    %1 = arith.extui %0 : i1 to i32
    %c0_i32 = arith.constant 0 : i32
    %c0_i32_0 = arith.constant 0 : i32
    %c0_i32_1 = arith.constant 0 : i32
    return %1, %c0_i32, %c0_i32_0 : i32, i32, i32
  }
  func.func @transform_5(%arg0: i32) -> (i32, i32, i32) {
    %c1_i32 = arith.constant 1 : i32
    %0 = arith.cmpi sge, %arg0, %c1_i32 : i32
    %1 = arith.extui %0 : i1 to i32
    %c0_i32 = arith.constant 0 : i32
    %c0_i32_0 = arith.constant 0 : i32
    %c0_i32_1 = arith.constant 0 : i32
    return %1, %c0_i32, %c0_i32_0 : i32, i32, i32
  }
  func.func @transform_6(%arg0: i32) -> (i32, i32, i32) {
    %c1_i32 = arith.constant 1 : i32
    %0 = arith.cmpi sge, %arg0, %c1_i32 : i32
    %1 = arith.extui %0 : i1 to i32
    %c0_i32 = arith.constant 0 : i32
    %c0_i32_0 = arith.constant 0 : i32
    %c0_i32_1 = arith.constant 0 : i32
    return %1, %c0_i32, %c0_i32_0 : i32, i32, i32
  }
  func.func @transform_7(%arg0: i32) -> (i32, i32, i32, i32) {
    %c1_i32 = arith.constant 1 : i32
    %0 = arith.cmpi sge, %arg0, %c1_i32 : i32
    %1 = arith.extui %0 : i1 to i32
    %c0_i32 = arith.constant 0 : i32
    %c0_i32_0 = arith.constant 0 : i32
    %c0_i32_1 = arith.constant 0 : i32
    %c0_i32_2 = arith.constant 0 : i32
    return %1, %c0_i32, %c0_i32_0, %c0_i32_1 : i32, i32, i32, i32
  }
  func.func @transform_8(%arg0: i32) -> (i32, i32) {
    %c0_i32 = arith.constant 0 : i32
    %c0_i32_0 = arith.constant 0 : i32
    return %c0_i32, %arg0 : i32, i32
  }
}

</mosaic_0001>

<bundles_post_ra>
// kernel: tpu_custom_call.1
= control target key start
LH: loop header
LB: loop body
LE: loop exit
PB: predicated region body
PF: predicated region fallthrough
CT: control target
= control target key end

     0   :  { %13 = vsyncpa [#allocation4], 0  ;;  %s1702_s0 = inlined_call_operand.vmem [shape: f32[16,512], index: 0, kind: input, shape index: {}]   ;;  %s1703_s1 = inlined_call_operand.vmem [shape: f32[2,32,16], index: 1, kind: input, shape index: {}]   ;;  %s1704_s2 = inlined_call_operand.vmem [shape: f32[2,32,1], index: 2, kind: input, shape index: {}]   ;;  %s1705_s3 = inlined_call_operand.vmem [shape: f32[2,32,32], index: 3, kind: input, shape index: {}]   ;;  %s1706_s4 = inlined_call_operand.vmem [shape: f32[2,32,1], index: 4, kind: input, shape index: {}]   ;;  %s1707_s5 = inlined_call_operand.vmem [shape: f32[2,32,32], index: 5, kind: input, shape index: {}]   ;;  %s1708_s6 = inlined_call_operand.vmem [shape: f32[2,32,1], index: 6, kind: input, shape index: {}]   ;;  %s1709_s7 = inlined_call_operand.vmem [shape: f32[2,3,32,1], index: 7, kind: input, shape index: {}]   ;;  %s1710_s8 = inlined_call_operand.hbm [shape: f32[32,512], index: 8, kind: output, shape index: {}]  }
   0x1   :  { %15 = vsyncpa [#allocation4 + $0x1], 0  ;;  %s1521_s27 = smov 0   ;;  %s1523_s28 = smov 0  }
   0x2   :  { %s1525_s29 = smov 0   ;;  %s1527_s30 = smov 0  }
   0x3 LB: > { %s1542_s9 = sadd.s32 4294967295, %s1468_s30   ;;  %s1286_s10 = sadd.s32 4294967294, %s1468_s30   ;;  %s1468_s30 = sphi %s1527_s30, %s1716_s30   ;;  %s1464_s29 = sphi %s1525_s29, %s1715_s29   ;;  %s1460_s28 = sphi %s1523_s28, %s1714_s28   ;;  %s1456_s27 = sphi %s1521_s27, %s1713_s27  }
   0x4   : > { %s1546_s11 = sadd.s32 1, %s1468_s30   ;;  %s28_s12 = sadd.s32 1, %s1464_s29 }
   0x5   : > { %s25_s13 = ssub.s32 %s1468_s30, %s1546_s11  ;;  %p35_p0 = scmp.ne.s32.totalorder %s1464_s29, %s1460_s28 }
   0x6   : > { %p26_p1 = scmp.eq.s32.totalorder %s25_s13, 0  ;;  %p36_p2 = scmp.eq.s32.totalorder %s1468_s30, 0 }
   0x7   : > { %p275_p3 = scmp.eq.s32.totalorder %s1542_s9, 1  ;;  %p280_p4 = scmp.ne.s32.totalorder %s1460_s28, %s1456_s27 }
   0x8   : > { %s1558_s14 = scalar_select %p26_p1, %s1464_s29, %s28_s12  }
   0x9   : > { %p37_p5 = por %p36_p2, %p35_p0  ;;  %p1560_p6 = por %p275_p3, %p35_p0 }
   0xa   : > { %p281_p7 = scmp.eq.s32.totalorder %s1286_s10, 1  ;;  %p1288_p9 = scmp.ge.s32.totalorder %s1468_s30, 2 }
   0xc   : > { %p1564_p8 = por %p281_p7, %p280_p4  ;;  %297 = sbr.rel (%p1288_p9) target bundleno = 26 (0x1a), region = 16 }
  0x13   : > { %300 = sbr.rel (!%p37_p5) target bundleno = 26 (0x1a), region = 20  ;;  %s302_s17 = sand.u32 (%p37_p5), 1, %s1464_s29  }
  0x14   : > { %s1325_s18 = sshll.u32 (%p37_p5), %s1468_s30, 4  ;;  %s1289_s19 = sshll.u32 (%p37_p5), %s302_s17, 5 }
  0x15   : > { %s307_s22 = scalar_lea.vmem (%p37_p5), %s1702_s0, %s1325_s18  ;;  %s304_s23 = scalar_lea.vmem (%p37_p5), [#allocation2], %s1289_s19 }
  0x16   : > { %v320_v0 = vld [vmem:[%s307_s22] sm:$0xff] (%p37_p5)  ;;  %v322_v1 = vld [vmem:[%s307_s22 + $0x8] sm:$0xff] (%p37_p5) }
  0x17   : > { %v324_v2 = vld [vmem:[%s307_s22 + $0x20] sm:$0xff] (%p37_p5)  ;;  %321 = vst [vmem:[%s304_s23] sm:$0xff] (%p37_p5), %v320_v0  ;;  %323 = vst [vmem:[%s304_s23 + $0x8] sm:$0xff] (%p37_p5), %v322_v1  ;;  %v326_v3 = vld [vmem:[%s307_s22 + $0x28] sm:$0xff] (%p37_p5) }
  0x18   : > { %325 = vst [vmem:[%s304_s23 + $0x10] sm:$0xff] (%p37_p5), %v324_v2  ;;  %327 = vst [vmem:[%s304_s23 + $0x18] sm:$0xff] (%p37_p5), %v326_v3 }
  0x1a PF: > { %p1292_p10 = scmp.ge.s32.totalorder %s1468_s30, 1  ;;  %p416_p11 = scmp.lt.s32.totalorder %s1468_s30, 3 }
  0x1c   : > { %p417_p12 = pnand %p1292_p10, %p416_p11 }
  0x1d   : > { %s1579_s24 = sand.u32 (!%p417_p12), 1, %s1460_s28   ;;  %v1470_v4 = vmov (!%p417_p12), 0.0   ;;  %p506_p13 = scmp.ge.s32.totalorder (!%p417_p12), %s1542_s9, 1  ;;  %v1471_v5 = vmov (!%p417_p12), 0   ;;  %vm602_vm0 = vcmask (!%p417_p12), 130048   ;;  %vm740_vm1 = vcmask (!%p417_p12), 261120  }
  0x1e   : > { %420 = sbr.rel (%p417_p12) target bundleno = 815 (0x32f), region = 71  ;;  %s1293_s25 = sshll.u32 (!%p417_p12), %s1579_s24, 5  ;;  %679 = vmatprep.mubr.f32.mxu0 (!%p417_p12), %v1470_v4  ;;  %691 = vmatprep.mubr.f32.mxu1 (!%p417_p12), %v1470_v4 }
  0x1f   : > { %1400 = vset.pattern.permute.xlu0 (!%p417_p12), %v1471_v5  ;;  %1401 = vset.pattern.permute.xlu1 (!%p417_p12), %v1471_v5  ;;  %s425_s26 = scalar_lea.vmem (!%p417_p12), [#allocation2], %s1293_s25  ;;  %s1332_s19 = sshll.u32 (!%p417_p12), %s1542_s9, 8 }
  0x20   : > { %v571_v6 = vld [vmem:[%s425_s26 + $0x8] sm:$0xff] (!%p417_p12)  ;;  %v573_v7 = vld [vmem:[%s425_s26 + $0x18] sm:$0xff] (!%p417_p12)  ;;  %v570_v8 = vld [vmem:[%s425_s26] sm:$0xff] (!%p417_p12) }
  0x21   : > { %v1333_v9 = vpack.c.bf16 (!%p417_p12), %v573_v7, %v571_v6  ;;  %v572_v10 = vld [vmem:[%s425_s26 + $0x10] sm:$0xff] (!%p417_p12) }
  0x22   : > { %v1335_v11 = vpack.c.bf16 (!%p417_p12), %v572_v10, %v570_v8 }
  0x23   : > { %1334 = vmatprep.subr.bf16.mxu0 (!%p417_p12), %v1333_v9  ;;  %1353 = vmatprep.subr.bf16.mxu1 (!%p417_p12), %v1333_v9 }
  0x24   : > { %1336 = vmatpush1.bf16.msra.mxu0 (!%p417_p12), %v1335_v11  ;;  %1354 = vmatpush1.bf16.msra.mxu1 (!%p417_p12), %v1335_v11 }
  0x25   : > { %s507_s10 = scalar_select %p506_p13, 1, 0 }
  0x27   : > { %p508_p0 = scmp.lt.s32.totalorder %s507_s10, 1 }
  0x29   : > { %s1718_s10 = smov (!%p508_p0, %s507_s10), 1 }
  0x2a   : > { %s1588_s12 = sshll.u32 %s1718_s10, 5 }
  0x2b   : > { %s512_s18 = scalar_lea.vmem %s1703_s1, %s1588_s12  ;;  %s521_s21 = scalar_lea.vmem %s1704_s2, %s1588_s12 }
  0x2c   : > { %v574_v12 = vld [vmem:[%s512_s18] sm:$0xff]  ;;  %v576_v13 = vld [vmem:[%s512_s18 + $0x10] sm:$0xff]  ;;  %v575_v16 = vld [vmem:[%s512_s18 + $0x8] sm:$0xff]  ;;  %s539_s25 = scalar_lea.vmem %s1706_s4, %s1588_s12  ;;  %s557_s17 = scalar_lea.vmem %s1708_s6, %s1588_s12 }
  0x2d   : > { %1308 = vmatmul.mubr.msk.f32.vlgmr.msra.gmra.mrb[0].mxu0 %vm602_vm0, %v574_v12  ;;  %1310 = vmatmul.mubr.msk.f32.vlgmr.msra.gmra.mrb[0].mxu1 %vm602_vm0, %v576_v13  ;;  %v578_v14 = vld [vmem:[%s521_s21] sm:$0xff]  ;;  %v580_v15 = vld [vmem:[%s521_s21 + $0x10] sm:$0xff]  ;;  %v577_v17 = vld [vmem:[%s512_s18 + $0x18] sm:$0xff]  ;;  %s1355_s18 = smul.u32 96, %s1718_s10  ;;  %s530_s23 = scalar_lea.vmem %s1705_s3, %s1588_s12 }
  0x2e   : > { %685 = vmatprep.mubr.f32.mxu0 %v1470_v4  ;;  %697 = vmatprep.mubr.f32.mxu1 %v1470_v4  ;;  %v579_v18 = vld [vmem:[%s521_s21 + $0x8] sm:$0xff]  ;;  %v581_v19 = vld [vmem:[%s521_s21 + $0x18] sm:$0xff]  ;;  %v716_v20 = vld [vmem:[%s539_s25] sm:$0xff]  ;;  %s548_s13 = scalar_lea.vmem %s1707_s5, %s1588_s12  ;;  %s1294_s12 = sshll.u32 %s1579_s24, 6 }
  0x2f   : > { %584 = vperm.xlu0 %1400, %v578_v14   ;;  %594 = vperm.xlu1 %1401, %v580_v15   ;;  %v717_v21 = vld [vmem:[%s539_s25 + $0x8] sm:$0xff]  ;;  %v718_v22 = vld [vmem:[%s539_s25 + $0x10] sm:$0xff]  ;;  %v719_v23 = vld [vmem:[%s539_s25 + $0x18] sm:$0xff]  ;;  %s566_s21 = scalar_lea.vmem %s1709_s7, %s1355_s18  ;;  %s1121_s10 = scalar_lea.sflag [#allocation4], %s1579_s24 }
  0x30   : > { %v854_v24 = vld [vmem:[%s557_s17] sm:$0xff]  ;;  %v855_v25 = vld [vmem:[%s557_s17 + $0x8] sm:$0xff]  ;;  %v856_v26 = vld [vmem:[%s557_s17 + $0x10] sm:$0xff] }
  0x31   : > { %1309 = vmatmul.mubr.msk.f32.gmra.mrb[2].mxu0 %vm602_vm0, %v575_v16  ;;  %1311 = vmatmul.mubr.msk.f32.gmra.mrb[2].mxu1 %vm602_vm0, %v577_v17  ;;  %v857_v27 = vld [vmem:[%s557_s17 + $0x18] sm:$0xff]  ;;  %v979_v28 = vld [vmem:[%s566_s21] sm:$0xff]  ;;  %v980_v29 = vld [vmem:[%s566_s21 + $0x8] sm:$0xff]  ;;  %s1641_s17 = scalar_lea.vmem [#allocation3], %s1294_s12 }
  0x32   : > { %817 = vmatprep.mubr.f32.mxu1 %v1470_v4  ;;  %954 = vmatprep.mubr.f32.mxu0 %v1470_v4  ;;  %v981_v30 = vld [vmem:[%s566_s21 + $0x10] sm:$0xff]  ;;  %v982_v31 = vld [vmem:[%s566_s21 + $0x18] sm:$0xff]  ;;  %v983_v32 = vld [vmem:[%s566_s21 + $0x20] sm:$0xff]  ;;  %s1134_s18 = sshll.u32 %s1641_s17, 4  ;;  %s1645_s18 = int_to_ptr.vmem [resolvable:$true] %s1134_s18 }
  0x33   : > { %589 = vperm.xlu0 %1400, %v579_v18   ;;  %599 = vperm.xlu1 %1401, %v581_v19   ;;  %v984_v33 = vld [vmem:[%s566_s21 + $0x28] sm:$0xff]  ;;  %v985_v34 = vld [vmem:[%s566_s21 + $0x30] sm:$0xff]  ;;  %v986_v35 = vld [vmem:[%s566_s21 + $0x38] sm:$0xff]  ;;  %s1650_s21 = scalar_lea.hbm %s1710_s8, %s1332_s19  ;;  %s1406_s22 = scalar_lea.vmem %s1645_s18, 1024 }
  0x34   : > { %v712_v5 = vld [vmem:[%s530_s23] sm:$0xff]  ;;  %v713_v6 = vld [vmem:[%s530_s23 + $0x8] sm:$0xff]  ;;  %v714_v7 = vld [vmem:[%s530_s23 + $0x10] sm:$0xff]  ;;  %p1407_p1 = scmp.ne.s32.totalorder %s1645_s18, %s1406_s22 }
  0x35   : > { %v715_v8 = vld [vmem:[%s530_s23 + $0x18] sm:$0xff]  ;;  %s1472_s23 = smov [#allocation3]  }
  0x36   : > { %p1408_p2 = pnand %p1407_p1, %p1560_p6  ;;  %s1410_s25 = sshll.u32 %s1472_s23, 4  ;;  %s1411_s25 = int_to_ptr.vmem [resolvable:$false] %s1410_s25 }
  0x37   : > { %722 = vperm.xlu0 %1400, %v716_v20   ;;  %727 = vperm.xlu1 %1401, %v717_v21   ;;  %s1412_s26 = scalar_lea.vmem %s1411_s25, 2048  ;;  %p1413_p4 = scmp.lt.s32.totalorder %s1645_s18, %s1411_s25 }
  0x38   : > { %p1409_p3 = pneg %p1408_p2  ;;  %p1414_p5 = scmp.lt.s32.totalorder %s1412_s26, %s1406_s22 }
  0x3a   : > { %p1415_p7 = por %p1414_p5, %p1413_p4 }
  0x3b   : > { %732 = vperm.xlu0 %1400, %v718_v22   ;;  %737 = vperm.xlu1 %1401, %v719_v23  }
  0x3c   : > { %p1416_p10 = pnand %p1415_p7, %p1409_p3 }
  0x3f   : > { %860 = vperm.xlu0 %1400, %v854_v24   ;;  %865 = vperm.xlu1 %1401, %v855_v25  }
  0x43   : > { %870 = vperm.xlu0 %1400, %v856_v26   ;;  %875 = vperm.xlu1 %1401, %v857_v27  }
  0x47   : > { %1058 = vperm.xlu0 %1400, %v979_v28   ;;  %1063 = vperm.xlu1 %1401, %v980_v29  }
  0x4b   : > { %1068 = vperm.xlu0 %1400, %v981_v30   ;;  %1073 = vperm.xlu1 %1401, %v982_v31  }
  0x4f   : > { %1086 = vperm.xlu0 %1400, %v983_v32   ;;  %1091 = vperm.xlu1 %1401, %v984_v33  }
  0x53   : > { %1096 = vperm.xlu0 %1400, %v985_v34   ;;  %1101 = vperm.xlu1 %1401, %v986_v35  }
  0xae   : > { %v585_v36 = vpop.permute.xlu0 %584  ;;  %v595_v37 = vpop.permute.xlu1 %594 }
  0xb2   : > { %v590_v44 = vpop.permute.xlu0 %589  ;;  %v600_v45 = vpop.permute.xlu1 %599 }
  0xb6   : > { %v723_v11 = vpop.permute.xlu0 %722  ;;  %v728_v13 = vpop.permute.xlu1 %727 }
  0xba   : > { %v733_v26 = vpop.permute.xlu0 %732  ;;  %v738_v29 = vpop.permute.xlu1 %737 }
 0x100   : > { %v681_v38 = vpop.f32.mrb[0].mxu0  ;;  %v693_v39 = vpop.f32.mrb[0].mxu1 }
 0x101   : > { %v683_v40 = vpop.f32.mrb[1].mxu0  ;;  %v694_v41 = vadd.f32 %v693_v39, %v595_v37  ;;  %v695_v42 = vpop.f32.mrb[1].mxu1  ;;  %v682_v46 = vadd.f32 %v681_v38, %v585_v36 }
 0x102   : > { %v696_v43 = vadd.f32 %v695_v42, %v595_v37  ;;  %v684_v47 = vadd.f32 %v683_v40, %v585_v36  ;;  %v851_v42 = vld [vmem:[%s548_s13 + $0x8] sm:$0xff] }
 0x103   : > { %v708_v50 = vmax.f32 %v694_v41, 0.0  ;;  %v704_v58 = vmax.f32 %v682_v46, 0.0  ;;  %v850_v41 = vld [vmem:[%s548_s13] sm:$0xff] }
 0x104   : > { %v687_v48 = vpop.f32.mrb[2].mxu0  ;;  %v699_v49 = vpop.f32.mrb[2].mxu1  ;;  %v709_v55 = vmax.f32 %v696_v43, 0.0  ;;  %v705_v61 = vmax.f32 %v684_v47, 0.0  ;;  %v852_v43 = vld [vmem:[%s548_s13 + $0x10] sm:$0xff] }
 0x105   : > { %v688_v51 = vadd.f32 %v687_v48, %v590_v44  ;;  %v700_v52 = vadd.f32 %v699_v49, %v600_v45  ;;  %v689_v53 = vpop.f32.mrb[3].mxu0  ;;  %v701_v54 = vpop.f32.mrb[3].mxu1 }
 0x106   : > { %v690_v56 = vadd.f32 %v689_v53, %v590_v44  ;;  %v702_v57 = vadd.f32 %v701_v54, %v600_v45  ;;  %v853_v44 = vld [vmem:[%s548_s13 + $0x18] sm:$0xff]  ;;  %v861_v47 = vpop.permute.xlu0 %860  ;;  %v866_v48 = vpop.permute.xlu1 %865 }
 0x107   : > { %v706_v59 = vmax.f32 %v688_v51, 0.0  ;;  %v710_v60 = vmax.f32 %v700_v52, 0.0 }
 0x108   : > { %v707_v62 = vmax.f32 %v690_v56, 0.0  ;;  %v711_v63 = vmax.f32 %v702_v57, 0.0 }
 0x109   : > { %v1339_v0 = vpack.c.bf16 %v706_v59, %v704_v58  ;;  %v1343_v1 = vpack.c.bf16 %v710_v60, %v708_v50 }
 0x10a   : > { %v1337_v2 = vpack.c.bf16 %v707_v62, %v705_v61  ;;  %v1341_v3 = vpack.c.bf16 %v711_v63, %v709_v55  ;;  %v871_v56 = vpop.permute.xlu0 %870  ;;  %v876_v62 = vpop.permute.xlu1 %875 }
 0x10c   : > { %1338 = vmatprep.subr.bf16.mxu1 %v1337_v2 }
 0x10d   : > { %1340 = vmatpush1.bf16.msra.mxu1 %v1339_v0 }
 0x10e   : > { %1342 = vmatprep.subr.bf16.mxu1 %v1341_v3 }
 0x111   : > { %1344 = vmatpush1.bf16.msra.mxu1 %v1343_v1 }
 0x114   : > { %1312 = vmatmul.mubr.msk.f32.vlgmr.msra.gmra.mrb[4].mxu1 %vm740_vm1, %v712_v5 }
 0x115   : > { %823 = vmatprep.mubr.f32.mxu1 %v1470_v4 }
 0x118   : > { %1313 = vmatmul.mubr.msk.f32.gmra.mrb[6].mxu1 %vm740_vm1, %v713_v6 }
 0x119   : > { %829 = vmatprep.mubr.f32.mxu1 %v1470_v4 }
 0x11c   : > { %1314 = vmatmul.mubr.msk.f32.gmra.mrb[8].mxu1 %vm740_vm1, %v714_v7 }
 0x11d   : > { %835 = vmatprep.mubr.f32.mxu1 %v1470_v4 }
 0x120   : > { %1315 = vmatmul.mubr.msk.f32.gmra.mrb[10].mxu1 %vm740_vm1, %v715_v8 }
 0x1e7   : > { %v819_v9 = vpop.f32.mrb[4].mxu1 }
 0x1e8   : > { %v821_v10 = vpop.f32.mrb[5].mxu1  ;;  %v820_v12 = vadd.f32 %v819_v9, %v723_v11 }
 0x1e9   : > { %v822_v14 = vadd.f32 %v821_v10, %v723_v11 }
 0x1ea   : > { %v842_v19 = vmax.f32 %v820_v12, 0.0 }
 0x1eb   : > { %v825_v15 = vpop.f32.mrb[6].mxu1  ;;  %v843_v21 = vmax.f32 %v822_v14, 0.0 }
 0x1ec   : > { %v826_v16 = vadd.f32 %v825_v15, %v728_v13  ;;  %v827_v17 = vpop.f32.mrb[7].mxu1 }
 0x1ed   : > { %v828_v18 = vadd.f32 %v827_v17, %v728_v13 }
 0x1ee   : > { %v844_v20 = vmax.f32 %v826_v16, 0.0 }
 0x1ef   : > { %v845_v22 = vmax.f32 %v828_v18, 0.0  ;;  %v831_v23 = vpop.f32.mrb[8].mxu1 }
 0x1f0   : > { %v1347_v24 = vpack.c.bf16 %v844_v20, %v842_v19  ;;  %v833_v25 = vpop.f32.mrb[9].mxu1  ;;  %v832_v28 = vadd.f32 %v831_v23, %v733_v26 }
 0x1f1   : > { %v1345_v27 = vpack.c.bf16 %v845_v22, %v843_v21  ;;  %v834_v30 = vadd.f32 %v833_v25, %v733_v26 }
 0x1f2   : > { %v846_v35 = vmax.f32 %v832_v28, 0.0 }
 0x1f3   : > { %v837_v31 = vpop.f32.mrb[10].mxu1  ;;  %1346 = vmatprep.subr.bf16.mxu0 %v1345_v27  ;;  %v847_v37 = vmax.f32 %v834_v30, 0.0 }
 0x1f4   : > { %v838_v32 = vadd.f32 %v837_v31, %v738_v29  ;;  %v839_v33 = vpop.f32.mrb[11].mxu1  ;;  %1348 = vmatpush1.bf16.msra.mxu0 %v1347_v24 }
 0x1f5   : > { %v840_v34 = vadd.f32 %v839_v33, %v738_v29 }
 0x1f6   : > { %v848_v36 = vmax.f32 %v838_v32, 0.0 }
 0x1f7   : > { %v849_v38 = vmax.f32 %v840_v34, 0.0 }
 0x1f8   : > { %v1351_v39 = vpack.c.bf16 %v848_v36, %v846_v35 }
 0x1f9   : > { %v1349_v40 = vpack.c.bf16 %v849_v38, %v847_v37 }
 0x1fb   : > { %1350 = vmatprep.subr.bf16.mxu0 %v1349_v40 }
 0x1fc   : > { %1352 = vmatpush1.bf16.msra.mxu0 %v1351_v39 }
 0x1ff   : > { %1316 = vmatmul.mubr.msk.f32.vlgmr.msra.gmra.mrb[4].mxu0 %vm740_vm1, %v850_v41 }
 0x200   : > { %960 = vmatprep.mubr.f32.mxu0 %v1470_v4 }
 0x203   : > { %1317 = vmatmul.mubr.msk.f32.gmra.mrb[6].mxu0 %vm740_vm1, %v851_v42 }
 0x204   : > { %966 = vmatprep.mubr.f32.mxu0 %v1470_v4 }
 0x207   : > { %1318 = vmatmul.mubr.msk.f32.gmra.mrb[8].mxu0 %vm740_vm1, %v852_v43 }
 0x208   : > { %972 = vmatprep.mubr.f32.mxu0 %v1470_v4 }
 0x20b   : > { %1319 = vmatmul.mubr.msk.f32.gmra.mrb[10].mxu0 %vm740_vm1, %v853_v44 }
 0x2d2   : > { %v956_v45 = vpop.f32.mrb[4].mxu0 }
 0x2d3   : > { %v958_v46 = vpop.f32.mrb[5].mxu0  ;;  %v957_v50 = vadd.f32 %v956_v45, %v861_v47 }
 0x2d4   : > { %v959_v53 = vadd.f32 %v958_v46, %v861_v47 }
 0x2d6   : > { %v962_v49 = vpop.f32.mrb[6].mxu0 }
 0x2d7   : > { %v963_v51 = vadd.f32 %v962_v49, %v866_v48  ;;  %v964_v52 = vpop.f32.mrb[7].mxu0 }
 0x2d8   : > { %v965_v54 = vadd.f32 %v964_v52, %v866_v48 }
 0x2d9   : > { %v987_v55 = vadd.f32 %v963_v51, %v957_v50 }
 0x2da   : > { %v996_v57 = vadd.f32 %v965_v54, %v959_v53  ;;  %v968_v58 = vpop.f32.mrb[8].mxu0 }
 0x2db   : > { %v969_v59 = vadd.f32 %v968_v58, %v871_v56  ;;  %v970_v60 = vpop.f32.mrb[9].mxu0 }
 0x2dc   : > { %v971_v4 = vadd.f32 %v970_v60, %v871_v56  ;;  %v1064_v56 = vpop.permute.xlu1 %1063 }
 0x2dd   : > { %v988_v61 = vadd.f32 %v987_v55, %v969_v59  ;;  %v1059_v55 = vpop.permute.xlu0 %1058 }
 0x2de   : > { %v997_v63 = vadd.f32 %v996_v57, %v971_v4  ;;  %v974_v0 = vpop.f32.mrb[10].mxu0 }
 0x2df   : > { %v975_v1 = vadd.f32 %v974_v0, %v876_v62  ;;  %v976_v2 = vpop.f32.mrb[11].mxu0 }
 0x2e0   : > { %v977_v3 = vadd.f32 %v976_v2, %v876_v62 }
 0x2e1   : > { %v989_v5 = vadd.f32 %v988_v61, %v975_v1  ;;  %v1074_v61 = vpop.permute.xlu1 %1073 }
 0x2e2   : > { %v998_v6 = vadd.f32 %v997_v63, %v977_v3 }
 0x2e3   : > { %v990_v7 = vrot.slane %v989_v5, 4 }
 0x2e4   : > { %v999_v8 = vrot.slane %v998_v6, 4 }
 0x2e5   : > { %v991_v9 = vadd.f32 %v990_v7, %v989_v5  ;;  %v1092_v63 = vpop.permute.xlu1 %1091 }
 0x2e6   : > { %v1000_v10 = vadd.f32 %v999_v8, %v998_v6 }
 0x2e7   : > { %v992_v11 = vrot.slane %v991_v9, 2 }
 0x2e8   : > { %v1001_v12 = vrot.slane %v1000_v10, 2 }
 0x2e9   : > { %v993_v13 = vadd.f32 %v992_v11, %v991_v9 }
 0x2ea   : > { %v1002_v14 = vadd.f32 %v1001_v12, %v1000_v10 }
 0x2eb   : > { %v994_v15 = vrot.slane %v993_v13, 1 }
 0x2ec   : > { %v1003_v16 = vrot.slane %v1002_v14, 1 }
 0x2ed   : > { %v995_v17 = vadd.f32 %v994_v15, %v993_v13 }
 0x2ee   : > { %v1004_v18 = vadd.f32 %v1003_v16, %v1002_v14  ;;  %v1102_v16 = vpop.permute.xlu1 %1101 }
 0x2ef   : > { %v1006_v19 = vmul.f32 0.03125, %v995_v17 }
 0x2f0   : > { %v1007_v20 = vmul.f32 0.03125, %v1004_v18 }
 0x2f1   : > { %v1008_v21 = vsub.f32 %v957_v50, %v1006_v19  ;;  %v1010_v22 = vsub.f32 %v963_v51, %v1006_v19  ;;  %v1012_v23 = vsub.f32 %v969_v59, %v1006_v19  ;;  %v1014_v24 = vsub.f32 %v975_v1, %v1006_v19 }
 0x2f2   : > { %v1009_v25 = vsub.f32 %v959_v53, %v1007_v20  ;;  %v1011_v26 = vsub.f32 %v965_v54, %v1007_v20  ;;  %v1013_v27 = vsub.f32 %v971_v4, %v1007_v20  ;;  %v1015_v28 = vsub.f32 %v977_v3, %v1007_v20  ;;  %v1069_v4 = vpop.permute.xlu0 %1068 }
 0x2f3   : > { %v1016_v29 = vmul.f32 %v1008_v21, %v1008_v21  ;;  %v1018_v30 = vmul.f32 %v1010_v22, %v1010_v22  ;;  %v1020_v33 = vmul.f32 %v1012_v23, %v1012_v23  ;;  %v1022_v37 = vmul.f32 %v1014_v24, %v1014_v24 }
 0x2f4   : > { %v1017_v31 = vmul.f32 %v1009_v25, %v1009_v25  ;;  %v1019_v32 = vmul.f32 %v1011_v26, %v1011_v26  ;;  %v1021_v35 = vmul.f32 %v1013_v27, %v1013_v27  ;;  %v1023_v39 = vmul.f32 %v1015_v28, %v1015_v28 }
 0x2f5   : > { %v1024_v34 = vadd.f32 %v1018_v30, %v1016_v29 }
 0x2f6   : > { %v1033_v36 = vadd.f32 %v1019_v32, %v1017_v31  ;;  %v1087_v62 = vpop.permute.xlu0 %1086 }
 0x2f7   : > { %v1025_v38 = vadd.f32 %v1024_v34, %v1020_v33 }
 0x2f8   : > { %v1034_v40 = vadd.f32 %v1033_v36, %v1021_v35 }
 0x2f9   : > { %v1026_v41 = vadd.f32 %v1025_v38, %v1022_v37 }
 0x2fa   : > { %v1035_v42 = vadd.f32 %v1034_v40, %v1023_v39  ;;  %v1097_v15 = vpop.permute.xlu0 %1096 }
 0x2fb   : > { %v1027_v43 = vrot.slane %v1026_v41, 4 }
 0x2fc   : > { %v1036_v44 = vrot.slane %v1035_v42, 4 }
 0x2fd   : > { %v1028_v45 = vadd.f32 %v1027_v43, %v1026_v41 }
 0x2fe   : > { %v1037_v46 = vadd.f32 %v1036_v44, %v1035_v42 }
 0x2ff   : > { %v1029_v47 = vrot.slane %v1028_v45, 2 }
 0x300   : > { %v1038_v48 = vrot.slane %v1037_v46, 2 }
 0x301   : > { %v1030_v49 = vadd.f32 %v1029_v47, %v1028_v45 }
 0x302   : > { %v1039_v50 = vadd.f32 %v1038_v48, %v1037_v46 }
 0x303   : > { %v1031_v51 = vrot.slane %v1030_v49, 1 }
 0x304   : > { %v1040_v52 = vrot.slane %v1039_v50, 1 }
 0x305   : > { %v1032_v53 = vadd.f32 %v1031_v51, %v1030_v49 }
 0x306   : > { %v1041_v54 = vadd.f32 %v1040_v52, %v1039_v50 }
 0x307   : > { %v1042_v57 = vmul.f32 0.03125, %v1032_v53 }
 0x308   : > { %v1043_v58 = vmul.f32 0.03125, %v1041_v54 }
 0x309   : > { %v1044_v59 = vadd.f32 1e-05, %v1042_v57 }
 0x30a   : > { %v1045_v60 = vadd.f32 1e-05, %v1043_v58 }
 0x30b   : > { %1402 = vrsqrt.f32 %v1044_v59 }
 0x30c   : > { %1404 = vrsqrt.f32 %v1045_v60 }
 0x315   : > { %v1403_v0 = vpop.eup %1402 }
 0x316   : > { %v1405_v1 = vpop.eup %1404  ;;  %v1048_v2 = vmul.f32 %v1403_v0, %v1008_v21  ;;  %v1050_v3 = vmul.f32 %v1403_v0, %v1010_v22  ;;  %v1052_v5 = vmul.f32 %v1403_v0, %v1012_v23  ;;  %v1054_v6 = vmul.f32 %v1403_v0, %v1014_v24 }
 0x317   : > { %v1049_v7 = vmul.f32 %v1405_v1, %v1009_v25  ;;  %v1051_v8 = vmul.f32 %v1405_v1, %v1011_v26  ;;  %v1053_v9 = vmul.f32 %v1405_v1, %v1013_v27  ;;  %v1055_v10 = vmul.f32 %v1405_v1, %v1015_v28 }
 0x318   : > { %v1076_v11 = vmul.f32 %v1059_v55, %v1048_v2  ;;  %v1078_v12 = vmul.f32 %v1064_v56, %v1050_v3  ;;  %v1080_v13 = vmul.f32 %v1069_v4, %v1052_v5  ;;  %v1082_v14 = vmul.f32 %v1074_v61, %v1054_v6 }
 0x319   : > { %v1077_v17 = vmul.f32 %v1059_v55, %v1049_v7  ;;  %v1079_v18 = vmul.f32 %v1064_v56, %v1051_v8  ;;  %v1081_v19 = vmul.f32 %v1069_v4, %v1053_v9  ;;  %v1083_v20 = vmul.f32 %v1074_v61, %v1055_v10 }
 0x31a   : > { %v1104_v21 = vadd.f32 %v1087_v62, %v1076_v11  ;;  %v1106_v22 = vadd.f32 %v1092_v63, %v1078_v12  ;;  %v1108_v23 = vadd.f32 %v1097_v15, %v1080_v13  ;;  %v1110_v24 = vadd.f32 %v1102_v16, %v1082_v14 }
 0x31b   : > { %v1105_v25 = vadd.f32 %v1087_v62, %v1077_v17  ;;  %v1107_v26 = vadd.f32 %v1092_v63, %v1079_v18  ;;  %v1109_v27 = vadd.f32 %v1097_v15, %v1081_v19  ;;  %v1111_v28 = vadd.f32 %v1102_v16, %v1083_v20 }
 0x31c   : > { %1112 = vst [vmem:[%s1641_s17] sm:$0xff] %v1104_v21  ;;  %1114 = vst [vmem:[%s1641_s17 + $0x10] sm:$0xff] %v1106_v22 }
 0x31d   : > { %1116 = vst [vmem:[%s1641_s17 + $0x20] sm:$0xff] %v1108_v23  ;;  %1118 = vst [vmem:[%s1641_s17 + $0x30] sm:$0xff] %v1110_v24 }
 0x31e   : > { %1113 = vst [vmem:[%s1641_s17 + $0x8] sm:$0xff] %v1105_v25  ;;  %1115 = vst [vmem:[%s1641_s17 + $0x18] sm:$0xff] %v1107_v26 }
 0x31f   : > { %1117 = vst [vmem:[%s1641_s17 + $0x28] sm:$0xff] %v1109_v27  ;;  %1119 = vst [vmem:[%s1641_s17 + $0x38] sm:$0xff] %v1111_v28 }
 0x320   : > { %1419 = shalt.err (!%p1416_p10)
}
 0x321   : > { %s1420_s13 = scalar_lea.hbm %s1650_s21, 1024  ;;  %s1424_s19 = scalar_lea.hbm %s1710_s8, 2048 }
 0x322   : > { %p1421_p11 = scmp.ne.s32.totalorder %s1650_s21, %s1420_s13  ;;  %p1425_p0 = scmp.lt.u32.totalorder %s1650_s21, %s1710_s8 }
 0x323   : > { %p1426_p1 = scmp.lt.u32.totalorder %s1424_s19, %s1420_s13  ;;  %p1428_p3 = scmp.lt.u32.totalorder %s1420_s13, %s1650_s21 }
 0x324   : > { %p1422_p12 = pnand %p1421_p11, %p1560_p6 }
 0x325   : > { %p1427_p2 = por %p1426_p1, %p1425_p0 }
 0x326   : > { %p1423_p13 = pneg %p1422_p12 }
 0x327   : > { %p1429_p4 = por %p1428_p3, %p1427_p2 }
 0x329   : > { %p1430_p5 = pnand %p1429_p4, %p1423_p13 }
 0x32b   : > { %1433 = shalt.err (!%p1430_p5)
}
 0x32c   : > { %s1473_s22 = smov 256   ;;  %s1474_s23 = smov 512  }
 0x32d   : > { %s1475_s25 = smov 16  }
 0x32e   : > { %1356 = dma.vmem_to_hbm [thread:$0]  (%p1560_p6), %s1645_s18, 1024, %s1650_s21, %s1121_s10, %s1473_s22, %s1474_s23, %s1475_s25  }
 0x32f PF: > { %s1149_s26 = sand.u32 1, %s1456_s27   ;;  %p1359_p7 = pnand %p1288_p9, %p1564_p8 }
 0x330   : > { %s1150_s13 = scalar_lea.sflag [#allocation4], %s1149_s26 }
 0x331   : > { %1451 = dma.done.wait (!%p1359_p7), %s1150_s13, 1024  }
 0x332   : > { %1453 = vsyncadd (!%p1359_p7), %s1150_s13, 4294966272  ;;  %p18_p10 = scmp.ge.s32.totalorder %s1546_s11, 4   ;;  %s1713_s27 = smov %s1460_s28 }
 0x333   : > { %s1714_s28 = smov %s1464_s29  ;;  %s1715_s29 = smov %s1558_s14 }
 0x334   : > { %s1716_s30 = smov %s1546_s11  ;;  %20 = sbr.rel (!%p18_p10) target bundleno = 3 (0x3), region = 136 }
 0x33b   :  { %1155 = vsyncpa [#allocation4], 1 }
 0x33c   :  { %1157 = vsyncpa [#allocation4 + $0x1], 1 }

</bundles_post_ra>
